<compile_context>
chip_gen: v7x
topology: tpu7x:2x2x1
jax: 0.10.0
libtpu: 0.0.40
codegen_flags: <defaults>
</compile_context>

<pallas_src>
import jax
import jax.numpy as jnp
from jax.experimental import pallas as pl
from jax.experimental.pallas import tpu as pltpu

_LANE = 128


def _npc_kernel(inv_tau_ref, x_ref, mem_ref, out_ref):
    # inv_tau_ref lives in SMEM via scalar prefetch: inv_tau_ref[0] = 1/tau.
    inv_tau = inv_tau_ref[0]
    # x_ref:   (batch, K)        grid-invariant LHS block (resident in VMEM).
    # mem_ref: (tile_n, K)       streamed row tile of memory (native layout).
    # Contract lhs dim 1 with rhs dim 1  ==  x @ mem_tile.T  (MXU, f32 accumulate).
    scores = jax.lax.dot_general(
        x_ref[...], mem_ref[...],
        dimension_numbers=(((1,), (1,)), ((), ())),
        preferred_element_type=jnp.float32,
    )
    # Scalar-broadcast scale on the VPU, lane-dense (batch, tile_n) store.
    out_ref[...] = (scores * inv_tau).astype(out_ref.dtype)


def _round_up(x, m):
    return ((x + m - 1) // m) * m


def _pick_tile_n(output_dim, input_dim, batch, max_tile_n, vmem_budget_bytes):
    """Largest lane-aligned (multiple-of-128) output tile within the VMEM budget.

    Per-grid-step f32 VMEM footprint (conservative):
      2 * tile_n * input_dim * 4   # double-buffered streamed memory tile
      2 * batch  * tile_n    * 4   # double-buffered output tile
      2 * batch  * input_dim * 4   # resident x block (counted x2 for safety)
    """
    fixed = 2 * batch * input_dim * 4
    per_col = (2 * input_dim + 2 * batch) * 4
    budget_cols = max((vmem_budget_bytes - fixed) // per_col, _LANE)
    tile = min(budget_cols, max_tile_n, _round_up(output_dim, _LANE))
    tile = max((tile // _LANE) * _LANE, _LANE)
    return int(tile)


def _vmem_footprint_bytes(tile_n, input_dim, batch):
    return 4 * (2 * tile_n * input_dim + 2 * batch * tile_n + 2 * batch * input_dim)


def non_parametric_classifier_forward(
    x, y, memory, params, *,
    max_tile_n=8192,
    vmem_budget_bytes=24 * 1024 * 1024,  # safe for v7x's 64 MiB/TC; fine on v5e/v6e
):
    """out = x @ memory.T / tau, computed in a Pallas TPU kernel.

    y is accepted for API parity with the PyTorch module but unused in forward.
    params = [tau, momentum] (momentum only used by the backward/memory update).
    """
    del y  # unused in the forward pass
    batch, input_dim = x.shape
    output_dim = memory.shape[0]

    tile_n = _pick_tile_n(output_dim, input_dim, batch, max_tile_n, vmem_budget_bytes)
    grid_n = pl.cdiv(output_dim, tile_n)  # partial last tile handled by masking

    # Hoist 1/tau out of the kernel; lands in SMEM via scalar prefetch.
    inv_tau = (1.0 / params[0]).reshape(1).astype(jnp.float32)

    # Explicit scoped-VMEM limit so large tiles don't trip the 16/32 MiB default;
    # capped well under v7x's 64 MiB/TC physical capacity.
    footprint = _vmem_footprint_bytes(tile_n, input_dim, batch)
    vmem_limit = min(48 * 1024 * 1024,
                     max(16 * 1024 * 1024, footprint + 4 * 1024 * 1024))

    grid_spec = pltpu.PrefetchScalarGridSpec(
        num_scalar_prefetch=1,            # inv_tau -> SMEM
        grid=(grid_n,),
        in_specs=[
            # x: full block, invariant across the output_dim grid (stays in VMEM).
            pl.BlockSpec((batch, input_dim), lambda j, s: (0, 0)),
            # memory: streamed, double-buffered (tile_n, K) row tiles, NATIVE layout.
            pl.BlockSpec((tile_n, input_dim), lambda j, s: (j, 0)),
        ],
        out_specs=pl.BlockSpec((batch, tile_n), lambda j, s: (0, j)),
    )

    cost = pl.CostEstimate(
        flops=2 * batch * input_dim * output_dim,
        transcendentals=0,
        bytes_accessed=4 * (input_dim * output_dim
                            + batch * input_dim
                            + batch * output_dim),
    )

    return pl.pallas_call(
        _npc_kernel,
        out_shape=jax.ShapeDtypeStruct((batch, output_dim), jnp.float32),
        grid_spec=grid_spec,
        compiler_params=pltpu.CompilerParams(
            # Independent column tiles: shard across both TCs on v7x.
            dimension_semantics=("parallel",),
            vmem_limit_bytes=int(vmem_limit),
        ),
        cost_estimate=cost,
    )(inv_tau, x, memory)


if __name__ == "__main__":
    # Small shapes consistent with the module's forward. Three cases exercise
    # (a) single big tile, (b) a multi-step pipelined grid, and (c) an
    # output_dim that is NOT a multiple of 128 (partial last tile / masked store).
    batch = 8
    input_dim = 32       # feature dim
    tau = 1.0
    momentum = 0.5

    key = jax.random.PRNGKey(0)
    kx, kmem, ky = jax.random.split(key, 3)
    params = jnp.array([tau, momentum], dtype=jnp.float32)

    def make_inputs(output_dim):
        # Deterministic buffer init mirroring the PyTorch __init__:
        #   stdv = 1/sqrt(input_dim/3); memory ~ U(-stdv, stdv)
        stdv = 1.0 / jnp.sqrt(jnp.asarray(input_dim / 3.0, dtype=jnp.float32))
        memory = (jax.random.uniform(kmem, (output_dim, input_dim),
                                     dtype=jnp.float32) * (2.0 * stdv) - stdv)
        x = jax.random.normal(kx, (batch, input_dim), dtype=jnp.float32)
        y = jax.random.randint(ky, (batch,), 0, output_dim, dtype=jnp.int32)
        return x, y, memory

    cases = [
        dict(output_dim=512, max_tile_n=8192),   # single lane-dense tile, grid=1
        dict(output_dim=512, max_tile_n=128),    # grid=4: exercises the pipelined path
        dict(output_dim=500, max_tile_n=8192),   # non-divisible N: partial last tile
    ]

    for c in cases:
        x, y, memory = make_inputs(c["output_dim"])
        out = non_parametric_classifier_forward(
            x, y, memory, params, max_tile_n=c["max_tile_n"])
        out = jax.block_until_ready(out)

        # Reference check in plain JAX.
        ref = (x @ memory.T) / tau
        assert out.shape == (batch, c["output_dim"]), f"bad shape for {c}"
        assert jnp.allclose(out, ref, atol=1e-5, rtol=1e-5), f"mismatch vs reference: {c}"

    print("KERNEL_OK")
</pallas_src>

<mosaic_0001>
module attributes {stable_mosaic.version = 11 : i64} {
  func.func @_npc_kernel(%arg0: i32, %arg1: memref<1xf32, #tpu.memory_space<smem>>, %arg2: memref<8x32xf32, #tpu.memory_space<vmem>>, %arg3: memref<512x32xf32, #tpu.memory_space<vmem>>, %arg4: memref<8x512xf32, #tpu.memory_space<vmem>>) attributes {dimension_semantics = [#tpu.dimension_semantics<parallel>], iteration_bounds = array<i64: 1>, scalar_prefetch = 1 : i64, scratch_operands = 0 : i64, tpu.core_type = #tpu.core_type<tc>, window_params = [{pipeline_mode = #tpu.pipeline_mode<synchronous>, transform_indices = @transform_0, window_bounds = array<i64: 8, 32>}, {transform_indices = @transform_1, window_bounds = array<i64: 512, 32>}, {transform_indices = @transform_2, window_bounds = array<i64: 8, 512>}]} {
    %c0 = arith.constant 0 : index
    %0 = memref.load %arg1[%c0] : memref<1xf32, #tpu.memory_space<smem>>
    %c0_0 = arith.constant 0 : index
    %c0_1 = arith.constant 0 : index
    %1 = vector.load %arg2[%c0_0, %c0_1] : memref<8x32xf32, #tpu.memory_space<vmem>>, vector<8x32xf32>
    %c0_2 = arith.constant 0 : index
    %c0_3 = arith.constant 0 : index
    %2 = vector.load %arg3[%c0_2, %c0_3] : memref<512x32xf32, #tpu.memory_space<vmem>>, vector<512x32xf32>
    %cst = arith.constant dense<0.000000e+00> : vector<8x512xf32>
    %3 = tpu.matmul %1, %2, %cst {dimension_numbers = #tpu.dot_dimension_numbers<[1], [1], [0], [0], [0, 0, 1, 0], [], []>} : vector<8x32xf32>, vector<512x32xf32>, vector<8x512xf32> -> vector<8x512xf32>
    %4 = vector.broadcast %0 : f32 to vector<8x512xf32>
    %5 = arith.mulf %3, %4 : vector<8x512xf32>
    %c0_4 = arith.constant 0 : index
    %c0_5 = arith.constant 0 : index
    %6 = vector.load %arg4[%c0_4, %c0_5] : memref<8x512xf32, #tpu.memory_space<vmem>>, vector<8x512xf32>
    tpu.vector_store %arg4[%c0_4, %c0_5], %5 {strides = array<i32>} : memref<8x512xf32, #tpu.memory_space<vmem>>, vector<8x512xf32>,
    return
  }
  func.func @transform_0(%arg0: i32, %arg1: memref<1xf32, #tpu.memory_space<smem>>) -> (i32, i32) {
    %c0_i32 = arith.constant 0 : i32
    %c0_i32_0 = arith.constant 0 : i32
    %c0_i32_1 = arith.constant 0 : i32
    return %c0_i32, %c0_i32_0 : i32, i32
  }
  func.func @transform_1(%arg0: i32, %arg1: memref<1xf32, #tpu.memory_space<smem>>) -> (i32, i32) {
    %c0_i32 = arith.constant 0 : i32
    %c0_i32_0 = arith.constant 0 : i32
    return %arg0, %c0_i32 : i32, i32
  }
  func.func @transform_2(%arg0: i32, %arg1: memref<1xf32, #tpu.memory_space<smem>>) -> (i32, i32) {
    %c0_i32 = arith.constant 0 : i32
    %c0_i32_0 = arith.constant 0 : i32
    return %c0_i32, %arg0 : i32, i32
  }
}

</mosaic_0001>

<bundles_post_ra>
// kernel: tpu_custom_call.1
= control target key start
LH: loop header
LB: loop body
LE: loop exit
PB: predicated region body
PF: predicated region fallthrough
CT: control target
= control target key end

     0   :  { %vm80_vm0 = vcmask 261120   ;;  %s1007_s0 = inlined_call_operand.<no memory space> [shape: f32[1], index: 0, kind: input, shape index: {}]   ;;  %s1008_s1 = inlined_call_operand.vmem [shape: f32[8,32], index: 1, kind: input, shape index: {}]   ;;  %s1009_s2 = inlined_call_operand.vmem [shape: f32[512,32], index: 2, kind: input, shape index: {}]   ;;  %s1010_s3 = inlined_call_operand.hbm [shape: f32[8,512], index: 3, kind: output, shape index: {}]  }
   0x1   :  { %v32_v0 = vld [vmem:[%s1009_s2 + $0x80] sm:$0xff]  ;;  %v33_v1 = vld [vmem:[%s1009_s2 + $0x88] sm:$0xff]  ;;  %vm728_vm1 = vmpackc.low %vm80_vm0, %vm80_vm0 }
   0x2   :  { %v64_v2 = vld [vmem:[%s1009_s2 + $0x180] sm:$0xff]  ;;  %v575_v3 = vpack.c.bf16 %v33_v1, %v32_v0  ;;  %v65_v5 = vld [vmem:[%s1009_s2 + $0x188] sm:$0xff]  ;;  %v34_v13 = vld [vmem:[%s1009_s2 + $0x90] sm:$0xff] }
   0x3   :  { %v16_v6 = vld [vmem:[%s1009_s2] sm:$0xff]  ;;  %v623_v7 = vpack.c.bf16 %v65_v5, %v64_v2  ;;  %v17_v8 = vld [vmem:[%s1009_s2 + $0x8] sm:$0xff]  ;;  %v35_v14 = vld [vmem:[%s1009_s2 + $0x98] sm:$0xff] }
   0x4   :  { %v48_v9 = vld [vmem:[%s1009_s2 + $0x100] sm:$0xff]  ;;  %v49_v10 = vld [vmem:[%s1009_s2 + $0x108] sm:$0xff]  ;;  %577 = vmatprep.subr.msk.bf16.mxu0 %vm728_vm1, %v575_v3  ;;  %v578_v11 = vpack.c.bf16 %v17_v8, %v16_v6  ;;  %v66_v15 = vld [vmem:[%s1009_s2 + $0x190] sm:$0xff]  ;;  %v581_v16 = vpack.c.bf16 %v35_v14, %v34_v13 }
   0x5   :  { %v626_v12 = vpack.c.bf16 %v49_v10, %v48_v9  ;;  %625 = vmatprep.subr.msk.bf16.mxu1 %vm728_vm1, %v623_v7  ;;  %v67_v17 = vld [vmem:[%s1009_s2 + $0x198] sm:$0xff]  ;;  %v18_v19 = vld [vmem:[%s1009_s2 + $0x10] sm:$0xff]  ;;  %v36_v23 = vld [vmem:[%s1009_s2 + $0xa0] sm:$0xff] }
   0x6   :  { %580 = vmatpush3.bf16.xpose.msk.msra.mxu0 %vm728_vm1, %v578_v11  ;;  %v629_v18 = vpack.c.bf16 %v67_v17, %v66_v15  ;;  %v19_v20 = vld [vmem:[%s1009_s2 + $0x18] sm:$0xff]  ;;  %v50_v21 = vld [vmem:[%s1009_s2 + $0x110] sm:$0xff]  ;;  %v37_v24 = vld [vmem:[%s1009_s2 + $0xa8] sm:$0xff] }
   0x7   :  { %628 = vmatpush3.bf16.xpose.msk.msra.mxu1 %vm728_vm1, %v626_v12  ;;  %583 = vmatprep.subr.msk.bf16.mxu0 %vm728_vm1, %v581_v16  ;;  %v51_v22 = vld [vmem:[%s1009_s2 + $0x118] sm:$0xff]  ;;  %v68_v25 = vld [vmem:[%s1009_s2 + $0x1a0] sm:$0xff]  ;;  %v69_v26 = vld [vmem:[%s1009_s2 + $0x1a8] sm:$0xff]  ;;  %v584_v27 = vpack.c.bf16 %v19_v20, %v18_v19  ;;  %v587_v29 = vpack.c.bf16 %v37_v24, %v36_v23 }
   0x8   :  { %631 = vmatprep.subr.msk.bf16.mxu1 %vm728_vm1, %v629_v18  ;;  %v632_v28 = vpack.c.bf16 %v51_v22, %v50_v21  ;;  %v635_v30 = vpack.c.bf16 %v69_v26, %v68_v25  ;;  %v20_v31 = vld [vmem:[%s1009_s2 + $0x20] sm:$0xff]  ;;  %v21_v32 = vld [vmem:[%s1009_s2 + $0x28] sm:$0xff]  ;;  %v38_v35 = vld [vmem:[%s1009_s2 + $0xb0] sm:$0xff] }
   0x9   :  { %v52_v33 = vld [vmem:[%s1009_s2 + $0x120] sm:$0xff]  ;;  %v53_v34 = vld [vmem:[%s1009_s2 + $0x128] sm:$0xff]  ;;  %v39_v36 = vld [vmem:[%s1009_s2 + $0xb8] sm:$0xff]  ;;  %v590_v39 = vpack.c.bf16 %v21_v32, %v20_v31 }
   0xa   :  { %v70_v37 = vld [vmem:[%s1009_s2 + $0x1b0] sm:$0xff]  ;;  %v71_v38 = vld [vmem:[%s1009_s2 + $0x1b8] sm:$0xff]  ;;  %v638_v40 = vpack.c.bf16 %v53_v34, %v52_v33  ;;  %v593_v41 = vpack.c.bf16 %v39_v36, %v38_v35  ;;  %v843_v46 = vld [vmem:[%s1008_s1] sm:$0xff] }
   0xb   :  { %v641_v42 = vpack.c.bf16 %v71_v38, %v70_v37  ;;  %v22_v43 = vld [vmem:[%s1009_s2 + $0x30] sm:$0xff]  ;;  %v23_v44 = vld [vmem:[%s1009_s2 + $0x38] sm:$0xff]  ;;  %v40_v48 = vld [vmem:[%s1009_s2 + $0xc0] sm:$0xff] }
   0xc   :  { %v54_v45 = vld [vmem:[%s1009_s2 + $0x130] sm:$0xff]  ;;  %v55_v47 = vld [vmem:[%s1009_s2 + $0x138] sm:$0xff] }
   0xe   :  { %586 = vmatpush3.bf16.xpose.msk.msra.mxu0 %vm728_vm1, %v584_v27 }
   0xf   :  { %634 = vmatpush3.bf16.xpose.msk.msra.mxu1 %vm728_vm1, %v632_v28  ;;  %589 = vmatprep.subr.msk.bf16.mxu0 %vm728_vm1, %v587_v29 }
  0x10   :  { %637 = vmatprep.subr.msk.bf16.mxu1 %vm728_vm1, %v635_v30 }
  0x16   :  { %592 = vmatpush3.bf16.xpose.msk.msra.mxu0 %vm728_vm1, %v590_v39 }
  0x17   :  { %640 = vmatpush3.bf16.xpose.msk.msra.mxu1 %vm728_vm1, %v638_v40  ;;  %595 = vmatprep.subr.msk.bf16.mxu0 %vm728_vm1, %v593_v41 }
  0x18   :  { %643 = vmatprep.subr.msk.bf16.mxu1 %vm728_vm1, %v641_v42 }
  0x19   :  { %9 = vsyncpa [#allocation5], 0  ;;  %v41_v49 = vld [vmem:[%s1009_s2 + $0xc8] sm:$0xff]  ;;  %v72_v50 = vld [vmem:[%s1009_s2 + $0x1c0] sm:$0xff]  ;;  %539 = vmatprep.mubr.msk.f32.mxu0 %vm80_vm0, %v843_v46  ;;  %573 = vmatprep.mubr.msk.f32.mxu1 %vm80_vm0, %v843_v46  ;;  %v596_v52 = vpack.c.bf16 %v23_v44, %v22_v43  ;;  %v644_v53 = vpack.c.bf16 %v55_v47, %v54_v45  ;;  %v418_v35 = vstv %s1007_s0  ;;  %s696_s6 = smov [#allocation4]  }
  0x1a   :  { %v73_v51 = vld [vmem:[%s1009_s2 + $0x1c8] sm:$0xff]  ;;  %v599_v54 = vpack.c.bf16 %v41_v49, %v40_v48  ;;  %v24_v56 = vld [vmem:[%s1009_s2 + $0x40] sm:$0xff]  ;;  %v42_v60 = vld [vmem:[%s1009_s2 + $0xd0] sm:$0xff] }
  0x1b   :  { %v647_v55 = vpack.c.bf16 %v73_v51, %v72_v50  ;;  %v25_v57 = vld [vmem:[%s1009_s2 + $0x48] sm:$0xff]  ;;  %v56_v58 = vld [vmem:[%s1009_s2 + $0x140] sm:$0xff]  ;;  %v43_v61 = vld [vmem:[%s1009_s2 + $0xd8] sm:$0xff] }
  0x1c   :  { %v57_v59 = vld [vmem:[%s1009_s2 + $0x148] sm:$0xff]  ;;  %v74_v62 = vld [vmem:[%s1009_s2 + $0x1d0] sm:$0xff]  ;;  %v75_v63 = vld [vmem:[%s1009_s2 + $0x1d8] sm:$0xff]  ;;  %v602_v0 = vpack.c.bf16 %v25_v57, %v24_v56  ;;  %v605_v2 = vpack.c.bf16 %v43_v61, %v42_v60 }
  0x1d   :  { %v650_v1 = vpack.c.bf16 %v57_v59, %v56_v58  ;;  %v653_v3 = vpack.c.bf16 %v75_v63, %v74_v62  ;;  %v26_v5 = vld [vmem:[%s1009_s2 + $0x50] sm:$0xff]  ;;  %v27_v6 = vld [vmem:[%s1009_s2 + $0x58] sm:$0xff]  ;;  %v44_v9 = vld [vmem:[%s1009_s2 + $0xe0] sm:$0xff] }
  0x1e   :  { %598 = vmatpush3.bf16.xpose.msk.msra.mxu0 %vm728_vm1, %v596_v52  ;;  %v58_v7 = vld [vmem:[%s1009_s2 + $0x150] sm:$0xff]  ;;  %v59_v8 = vld [vmem:[%s1009_s2 + $0x158] sm:$0xff]  ;;  %v45_v10 = vld [vmem:[%s1009_s2 + $0xe8] sm:$0xff]  ;;  %v608_v13 = vpack.c.bf16 %v27_v6, %v26_v5 }
  0x1f   :  { %646 = vmatpush3.bf16.xpose.msk.msra.mxu1 %vm728_vm1, %v644_v53  ;;  %601 = vmatprep.subr.msk.bf16.mxu0 %vm728_vm1, %v599_v54  ;;  %v76_v11 = vld [vmem:[%s1009_s2 + $0x1e0] sm:$0xff]  ;;  %v77_v12 = vld [vmem:[%s1009_s2 + $0x1e8] sm:$0xff]  ;;  %v656_v14 = vpack.c.bf16 %v59_v8, %v58_v7  ;;  %v611_v15 = vpack.c.bf16 %v45_v10, %v44_v9  ;;  %v46_v21 = vld [vmem:[%s1009_s2 + $0xf0] sm:$0xff] }
  0x20   :  { %649 = vmatprep.subr.msk.bf16.mxu1 %vm728_vm1, %v647_v55  ;;  %v659_v16 = vpack.c.bf16 %v77_v12, %v76_v11  ;;  %v28_v17 = vld [vmem:[%s1009_s2 + $0x60] sm:$0xff]  ;;  %v29_v18 = vld [vmem:[%s1009_s2 + $0x68] sm:$0xff]  ;;  %v47_v22 = vld [vmem:[%s1009_s2 + $0xf8] sm:$0xff] }
  0x21   :  { %v60_v19 = vld [vmem:[%s1009_s2 + $0x160] sm:$0xff]  ;;  %v61_v20 = vld [vmem:[%s1009_s2 + $0x168] sm:$0xff]  ;;  %v78_v23 = vld [vmem:[%s1009_s2 + $0x1f0] sm:$0xff]  ;;  %v614_v25 = vpack.c.bf16 %v29_v18, %v28_v17  ;;  %v617_v27 = vpack.c.bf16 %v47_v22, %v46_v21 }
  0x22   :  { %v79_v24 = vld [vmem:[%s1009_s2 + $0x1f8] sm:$0xff]  ;;  %v662_v26 = vpack.c.bf16 %v61_v20, %v60_v19  ;;  %v30_v29 = vld [vmem:[%s1009_s2 + $0x70] sm:$0xff] }
  0x23   :  { %v665_v28 = vpack.c.bf16 %v79_v24, %v78_v23  ;;  %v31_v30 = vld [vmem:[%s1009_s2 + $0x78] sm:$0xff]  ;;  %v62_v31 = vld [vmem:[%s1009_s2 + $0x170] sm:$0xff] }
  0x24   :  { %v63_v32 = vld [vmem:[%s1009_s2 + $0x178] sm:$0xff]  ;;  %v620_v33 = vpack.c.bf16 %v31_v30, %v30_v29  ;;  %s433_s2 = sshll.u32 %s696_s6, 4  ;;  %s434_s2 = int_to_ptr.vmem [resolvable:$true] %s433_s2 }
  0x25   :  { %v668_v34 = vpack.c.bf16 %v63_v32, %v62_v31  ;;  %s672_s7 = scalar_lea.vmem %s434_s2, 512  ;;  %p677_p1 = scmp.lt.s32.totalorder %s434_s2, %s434_s2 }
  0x26   :  { %604 = vmatpush3.bf16.xpose.msk.msra.mxu0 %vm728_vm1, %v602_v0  ;;  %p673_p0 = scmp.ne.s32.totalorder %s434_s2, %s672_s7  ;;  %p678_p2 = scmp.lt.s32.totalorder %s672_s7, %s672_s7 }
  0x27   :  { %652 = vmatpush3.bf16.xpose.msk.msra.mxu1 %vm728_vm1, %v650_v1  ;;  %607 = vmatprep.subr.msk.bf16.mxu0 %vm728_vm1, %v605_v2 }
  0x28   :  { %655 = vmatprep.subr.msk.bf16.mxu1 %vm728_vm1, %v653_v3  ;;  %p679_p3 = por %p678_p2, %p677_p1 }
  0x2a   :  { %p680_p4 = pnand %p679_p3, %p673_p0 }
  0x2e   :  { %610 = vmatpush3.bf16.xpose.msk.msra.mxu0 %vm728_vm1, %v608_v13 }
  0x2f   :  { %658 = vmatpush3.bf16.xpose.msk.msra.mxu1 %vm728_vm1, %v656_v14  ;;  %613 = vmatprep.subr.msk.bf16.mxu0 %vm728_vm1, %v611_v15 }
  0x30   :  { %661 = vmatprep.subr.msk.bf16.mxu1 %vm728_vm1, %v659_v16 }
  0x36   :  { %616 = vmatpush3.bf16.xpose.msk.msra.mxu0 %vm728_vm1, %v614_v25 }
  0x37   :  { %664 = vmatpush3.bf16.xpose.msk.msra.mxu1 %vm728_vm1, %v662_v26  ;;  %619 = vmatprep.subr.msk.bf16.mxu0 %vm728_vm1, %v617_v27 }
  0x38   :  { %667 = vmatprep.subr.msk.bf16.mxu1 %vm728_vm1, %v665_v28 }
  0x3e   :  { %622 = vmatpush3.bf16.xpose.msk.msra.mxu0 %vm728_vm1, %v620_v33 }
  0x3f   :  { %670 = vmatpush3.bf16.xpose.msk.msra.mxu1 %vm728_vm1, %v668_v34 }
  0x45   :  { %540 = vmatmul.mubr.msk.f32.vlgmr.msra.gmra.mrb[0].mxu0 %vm80_vm0, %v843_v46 }
  0x46   :  { %574 = vmatmul.mubr.msk.f32.vlgmr.msra.gmra.mrb[0].mxu1 %vm80_vm0, %v843_v46 }
 0x118   :  { %v342_v36 = vpop.f32.mrb[0].mxu0 }
 0x119   :  { %v413_v37 = vpop.f32.mrb[0].mxu1  ;;  %v419_v38 = vmul.f32 %v418_v35, %v342_v36  ;;  %v344_v40 = vpop.f32.mrb[1].mxu0 }
 0x11a   :  { %v421_v39 = vmul.f32 %v418_v35, %v413_v37  ;;  %v415_v41 = vpop.f32.mrb[1].mxu1  ;;  %v420_v4 = vmul.f32 %v418_v35, %v344_v40 }
 0x11b   :  { %v422_v42 = vmul.f32 %v418_v35, %v415_v41  ;;  %423 = vst [vmem:[#allocation4] sm:$0xff] %v419_v38 }
 0x11c   :  { %425 = vst [vmem:[#allocation4 + $0x10] sm:$0xff] %v421_v39  ;;  %424 = vst [vmem:[#allocation4 + $0x8] sm:$0xff] %v420_v4 }
 0x11d   :  { %426 = vst [vmem:[#allocation4 + $0x18] sm:$0xff] %v422_v42 }
 0x11e   :  { %683 = shalt.err (!%p680_p4)
}
 0x11f   :  { %s684_s9 = scalar_lea.hbm %s1010_s3, 512 }
 0x120   :  { %p685_p5 = scmp.ne.s32.totalorder %s1010_s3, %s684_s9  ;;  %p688_p6 = scmp.lt.u32.totalorder %s684_s9, %s1010_s3 }
 0x122   :  { %p690_p7 = pnand %p688_p6, %p685_p5 }
 0x124   :  { %693 = shalt.err (!%p690_p7)
}
 0x125   :  { %436 = dma.vmem_to_hbm [thread:$0]  %s434_s2, 512, %s1010_s3, [#allocation5]  }
 0x126   :  { %694 = dma.done.wait [#allocation5], 512  }
 0x127   :  { %695 = vsyncadd [#allocation5], 4294966784 }
 0x128   :  { %440 = vsyncpa [#allocation5], 1 }

</bundles_post_ra>
